<compile_context>
chip_gen: v6e
topology: v6e:2x2x1
jax: 0.10.0
libtpu: 0.0.40
codegen_flags: <defaults>
</compile_context>

<pallas_src>
import math
import numpy as np
import jax
import jax.numpy as jnp
from jax.experimental import pallas as pl
from jax.experimental.pallas import tpu as pltpu


# ---------------------------------------------------------------------------
# Kernel: 1x1 conv + bias on one (batch-block, HW-tile) block.
# ---------------------------------------------------------------------------
def _conv1x1_kernel(x_ref, w_ref, b_ref, o_ref):
    # x_ref: (Nb, Cin, T)  w_ref: (Cout, Cin)  b_ref: (Cout, 1)  o_ref: (Nb, Cout, T)
    w = w_ref[...]
    b = b_ref[...]
    prec = (jax.lax.Precision.HIGHEST
            if x_ref.dtype == jnp.float32 else jax.lax.Precision.DEFAULT)
    for i in range(x_ref.shape[0]):      # Nb is small & static -> unrolled 2-D dots
        y = jnp.dot(w, x_ref[i], preferred_element_type=jnp.float32, precision=prec)
        o_ref[i] = (y + b).astype(o_ref.dtype)


def _round_up(v, m):
    return (v + m - 1) // m * m


def _choose_blocks(n, cin, hw, itemsize, x_budget_bytes, max_nb=8):
    """Pick (Nb, T, padded_HW): Nb | n, T a multiple of 128, Nb*Cin*T*itemsize ~ budget."""
    hw128 = _round_up(hw, 128)
    per_image = cin * hw128 * itemsize
    if per_image >= x_budget_bytes:
        # Large images: tile the spatial axis, one image per step.
        nb = 1
        t = max(128, (x_budget_bytes // (cin * itemsize)) // 128 * 128)
        t = min(t, hw128)
    else:
        # Small images: whole (padded) image per step, batch several images.
        t = hw128
        nb_target = min(max_nb, max(1, x_budget_bytes // per_image))
        nb = max(d for d in range(1, n + 1) if n % d == 0 and d <= nb_target)
    # Prefer >= 2 grid steps (pipelining; v7x has 2 TensorCores per chip).
    if (n // nb) * pl.cdiv(hw128, t) < 2:
        if nb > 1 and nb % 2 == 0:
            nb //= 2
        elif t >= 256:
            t = (t // 2) // 128 * 128
    hw_pad = pl.cdiv(hw128, t) * t
    return nb, t, hw_pad


def out_conv(x_nchw, w_oi, bias, *, io_dtype=None, x_budget_bytes=4 << 20):
    """OutConv.forward: 1x1 Conv2d with bias. x: (N, Cin, H, W) -> (N, Cout, H, W)."""
    if io_dtype is not None:                  # optional bf16 I/O path (halves HBM reads)
        x_nchw = x_nchw.astype(io_dtype)
        w_oi = w_oi.astype(io_dtype)
    n, cin, h, w = x_nchw.shape
    cout = w_oi.shape[0]
    hw = h * w
    itemsize = jnp.dtype(x_nchw.dtype).itemsize

    nb, t, hw_pad = _choose_blocks(n, cin, hw, itemsize, x_budget_bytes)

    x_flat = x_nchw.reshape(n, cin, hw)       # contiguous reshape, no data movement
    if hw_pad != hw:                          # lane-pad so every tile is 128-dense
        x_flat = jnp.pad(x_flat, ((0, 0), (0, 0), (0, hw_pad - hw)))

    grid = (n // nb, hw_pad // t)
    cost = pl.CostEstimate(
        flops=2 * n * cout * cin * hw,
        transcendentals=0,
        bytes_accessed=itemsize * (n * cin * hw + n * cout * hw)
        + itemsize * cout * cin + 4 * cout,
    )

    y_flat = pl.pallas_call(
        _conv1x1_kernel,
        out_shape=jax.ShapeDtypeStruct((n, cout, hw_pad), x_nchw.dtype),
        grid=grid,
        in_specs=[
            pl.BlockSpec((nb, cin, t), lambda i, j: (i, 0, j)),
            pl.BlockSpec((cout, cin), lambda i, j: (0, 0)),   # resident weight
            pl.BlockSpec((cout, 1), lambda i, j: (0, 0)),     # resident bias (f32)
        ],
        out_specs=pl.BlockSpec((nb, cout, t), lambda i, j: (i, 0, j)),
        compiler_params=pltpu.CompilerParams(
            dimension_semantics=("parallel", "parallel"),
            vmem_limit_bytes=32 * 1024 * 1024),
        cost_estimate=cost,
    )(x_flat, w_oi, bias.astype(jnp.float32).reshape(cout, 1))

    if hw_pad != hw:
        y_flat = y_flat[:, :, :hw]
    return y_flat.reshape(n, cout, h, w)


# ---------------------------------------------------------------------------
# Parameter init matching nn.Conv2d(in, out, kernel_size=1) defaults.
# ---------------------------------------------------------------------------
def init_params(in_channels, out_channels, key):
    k1, k2 = jax.random.split(key)
    fan_in = in_channels * 1 * 1
    bound = 1.0 / math.sqrt(fan_in)
    w = jax.random.uniform(k1, (out_channels, in_channels), jnp.float32, -bound, bound)
    b = jax.random.uniform(k2, (out_channels,), jnp.float32, -bound, bound)
    return {"w": w, "b": b}


# Pure-JAX reference for correctness checking.
def ref_out_conv(x, w, b):
    y = jnp.einsum("oc,nchw->nohw", w, x, precision=jax.lax.Precision.HIGHEST)
    return y + b[None, :, None, None]


if __name__ == "__main__":
    # OutConv(in_channels=32, out_channels=4) on a small NCHW input.
    N, Cin, Cout, H, W = 2, 32, 4, 16, 16

    key = jax.random.PRNGKey(0)
    kx, kp = jax.random.split(key)
    x = jax.random.normal(kx, (N, Cin, H, W), jnp.float32)
    params = init_params(Cin, Cout, kp)

    # f32 path.
    out = jax.block_until_ready(out_conv(x, params["w"], params["b"]))
    ref = jax.block_until_ready(ref_out_conv(x, params["w"], params["b"]))
    assert out.shape == (N, Cout, H, W), out.shape
    np.testing.assert_allclose(np.asarray(out), np.asarray(ref), rtol=1e-5, atol=1e-5)

    # bf16 I/O path (halves HBM read traffic); f32 accumulation, looser tolerance.
    out_bf16 = jax.block_until_ready(
        out_conv(x, params["w"], params["b"], io_dtype=jnp.bfloat16))
    assert out_bf16.dtype == jnp.bfloat16, out_bf16.dtype
    np.testing.assert_allclose(np.asarray(out_bf16, np.float32), np.asarray(ref),
                               rtol=5e-2, atol=5e-2)

    # Non-128-divisible H*W exercises the lane-padding path (was the full-extent fallback).
    x2 = jax.random.normal(kx, (1, Cin, 10, 10), jnp.float32)
    out2 = jax.block_until_ready(out_conv(x2, params["w"], params["b"]))
    ref2 = jax.block_until_ready(ref_out_conv(x2, params["w"], params["b"]))
    np.testing.assert_allclose(np.asarray(out2), np.asarray(ref2), rtol=1e-5, atol=1e-5)

    print("KERNEL_OK")
</pallas_src>

<mosaic_0001>
module attributes {stable_mosaic.version = 11 : i64} {
  func.func @_conv1x1_kernel(%arg0: i32, %arg1: i32, %arg2: memref<1x32x256xf32, #tpu.memory_space<vmem>>, %arg3: memref<4x32xf32, #tpu.memory_space<vmem>>, %arg4: memref<4x1xf32, #tpu.memory_space<vmem>>, %arg5: memref<1x4x256xf32, #tpu.memory_space<vmem>>) attributes {dimension_semantics = [#tpu.dimension_semantics<parallel>, #tpu.dimension_semantics<parallel>], iteration_bounds = array<i64: 2, 1>, scalar_prefetch = 0 : i64, scratch_operands = 0 : i64, tpu.core_type = #tpu.core_type<tc>, window_params = [{transform_indices = @transform_0, window_bounds = array<i64: 1, 32, 256>}, {pipeline_mode = #tpu.pipeline_mode<synchronous>, transform_indices = @transform_1, window_bounds = array<i64: 4, 32>}, {pipeline_mode = #tpu.pipeline_mode<synchronous>, transform_indices = @transform_2, window_bounds = array<i64: 4, 1>}, {transform_indices = @transform_3, window_bounds = array<i64: 1, 4, 256>}]} {
    %c0 = arith.constant 0 : index
    %c0_0 = arith.constant 0 : index
    %0 = vector.load %arg3[%c0, %c0_0] : memref<4x32xf32, #tpu.memory_space<vmem>>, vector<4x32xf32>
    %c0_1 = arith.constant 0 : index
    %c0_2 = arith.constant 0 : index
    %1 = vector.load %arg4[%c0_1, %c0_2] : memref<4x1xf32, #tpu.memory_space<vmem>>, vector<4x1xf32>
    %c0_3 = arith.constant 0 : index
    %c0_4 = arith.constant 0 : index
    %c0_5 = arith.constant 0 : index
    %2 = vector.load %arg2[%c0_3, %c0_4, %c0_5] : memref<1x32x256xf32, #tpu.memory_space<vmem>>, vector<1x32x256xf32>
    %3 = vector.shape_cast %2 : vector<1x32x256xf32> to vector<32x256xf32>
    %cst = arith.constant dense<0.000000e+00> : vector<4x256xf32>
    %4 = tpu.matmul %0, %3, %cst {dimension_numbers = #tpu.dot_dimension_numbers<[1], [0], [0], [1], [0, 0, 1, 1], [], []>, precision = #tpu.contract_precision<fp32>} : vector<4x32xf32>, vector<32x256xf32>, vector<4x256xf32> -> vector<4x256xf32>
    %5 = vector.broadcast %1 : vector<4x1xf32> to vector<4x256xf32>
    %6 = arith.addf %4, %5 : vector<4x256xf32>
    %c0_6 = arith.constant 0 : index
    %c0_7 = arith.constant 0 : index
    %c0_8 = arith.constant 0 : index
    %7 = vector.load %arg5[%c0_6, %c0_7, %c0_8] : memref<1x4x256xf32, #tpu.memory_space<vmem>>, vector<1x4x256xf32>
    %8 = vector.shape_cast %7 : vector<1x4x256xf32> to vector<4x256xf32>
    %9 = vector.shape_cast %6 : vector<4x256xf32> to vector<1x4x256xf32>
    tpu.vector_store %arg5[%c0_6, %c0_7, %c0_8], %9 {strides = array<i32>} : memref<1x4x256xf32, #tpu.memory_space<vmem>>, vector<1x4x256xf32>,
    return
  }
  func.func @transform_0(%arg0: i32, %arg1: i32) -> (i32, i32, i32) {
    %c0_i32 = arith.constant 0 : i32
    %c0_i32_0 = arith.constant 0 : i32
    return %arg0, %c0_i32, %arg1 : i32, i32, i32
  }
  func.func @transform_1(%arg0: i32, %arg1: i32) -> (i32, i32) {
    %c0_i32 = arith.constant 0 : i32
    %c0_i32_0 = arith.constant 0 : i32
    %c0_i32_1 = arith.constant 0 : i32
    return %c0_i32, %c0_i32_0 : i32, i32
  }
  func.func @transform_2(%arg0: i32, %arg1: i32) -> (i32, i32) {
    %c0_i32 = arith.constant 0 : i32
    %c0_i32_0 = arith.constant 0 : i32
    %c0_i32_1 = arith.constant 0 : i32
    return %c0_i32, %c0_i32_0 : i32, i32
  }
  func.func @transform_3(%arg0: i32, %arg1: i32) -> (i32, i32, i32) {
    %c0_i32 = arith.constant 0 : i32
    %c0_i32_0 = arith.constant 0 : i32
    return %arg0, %c0_i32, %arg1 : i32, i32, i32
  }
}

</mosaic_0001>

<bundles_post_ra>
// kernel: tpu_custom_call.1
= control target key start
LH: loop header
LB: loop body
LE: loop exit
PB: predicated region body
PF: predicated region fallthrough
CT: control target
= control target key end

     0   :  { %8 = vsyncpa [#allocation3], 0  ;;  %s1332_s0 = inlined_call_operand.hbm [shape: f32[2,32,256], index: 0, kind: input, shape index: {}]   ;;  %s1333_s1 = inlined_call_operand.vmem [shape: f32[4,32], index: 1, kind: input, shape index: {}]   ;;  %s1334_s2 = inlined_call_operand.vmem [shape: f32[4,1], index: 2, kind: input, shape index: {}]   ;;  %s1335_s3 = inlined_call_operand.hbm [shape: f32[2,4,256], index: 3, kind: output, shape index: {}]  }
   0x1   :  { %10 = vsyncpa [#allocation3 + $0x1], 0 }
   0x2   :  { %11 = vsyncpa [#allocation4], 0 }
   0x3   :  { %13 = vsyncpa [#allocation4 + $0x1], 0  ;;  %s1097_s12 = smov 0   ;;  %s1099_s13 = smov 0  }
   0x4   :  { %s1101_s14 = smov 0   ;;  %s1103_s15 = smov 0  }
   0x5   :  { %s1105_s16 = smov 0   ;;  %s1107_s17 = smov 0  }
   0x6 LB: > { %s877_s18 = sadd.s32 4294967295, %s1069_s17   ;;  %s878_s19 = sadd.s32 4294967294, %s1069_s17   ;;  %s1069_s17 = sphi %s1107_s17, %s19_s17   ;;  %s1065_s16 = sphi %s1105_s16, %s1346_s16   ;;  %s1061_s15 = sphi %s1103_s15, %s1345_s15   ;;  %s1057_s14 = sphi %s1101_s14, %s1344_s14   ;;  %s1053_s13 = sphi %s1099_s13, %s1343_s13   ;;  %s1049_s12 = sphi %s1097_s12, %s1342_s12  }
   0x7   : > { %s31_s20 = sadd.s32 1, %s1065_s16  ;;  %s40_s21 = sadd.s32 1, %s1057_s14 }
   0x8   : > { %p33_p0 = scmp.ge.s32.totalorder %s31_s20, 2  ;;  %p47_p1 = scmp.ne.s32.totalorder %s1057_s14, %s1053_s13 }
   0x9   : > { %p48_p2 = scmp.eq.s32.totalorder %s1069_s17, 0  ;;  %p53_p3 = scmp.ne.s32.totalorder %s1053_s13, %s1049_s12 }
   0xa   : > { %s1348_s20 = smov (%p33_p0, %s31_s20), 0  ;;  %p54_p5 = scmp.eq.s32.totalorder %s877_s18, 0 }
   0xb   : > { %p1138_p4 = por %p48_p2, %p47_p1  ;;  %s35_s23 = ssub.s32 %s1065_s16, %s1348_s20 }
   0xc   : > { %p121_p6 = scmp.eq.s32.totalorder %s877_s18, 1  ;;  %p38_p7 = scmp.eq.s32.totalorder %s35_s23, 0 }
   0xd   : > { %p1144_p8 = por %p54_p5, %p53_p3  ;;  %p127_p10 = scmp.eq.s32.totalorder %s878_s19, 1 }
   0xe   : > { %p1148_p9 = por %p121_p6, %p47_p1  ;;  %p906_p13 = scmp.lt.s32.totalorder %s1069_s17, 2 }
   0xf   : > { %s1153_s26 = scalar_select %p38_p7, %s1057_s14, %s40_s21  }
  0x10   : > { %p1155_p11 = por %p127_p10, %p53_p3  ;;  %s153_s28 = sand.u32 1, %s1057_s14  }
  0x11   : > { %s881_s29 = sshll.u32 %s153_s28, 6  ;;  %s892_s30 = sshll.u32 %s1065_s16, 10 }
  0x12   : > { %s165_s6 = scalar_lea.hbm %s1332_s0, %s892_s30  ;;  %s157_s7 = scalar_lea.vmem [#allocation2], %s881_s29 }
  0x13   : > { %s166_s8 = sshll.u32 %s157_s7, 4  ;;  %p1168_p0 = pnand %p906_p13, %p1138_p4  ;;  %s167_s8 = int_to_ptr.vmem [resolvable:$true] %s166_s8 }
  0x14   : > { %p884_p1 = scmp.ge.s32.totalorder %s1069_s17, 1  ;;  %s154_s10 = scalar_lea.sflag [#allocation3], %s153_s28 }
  0x15   : > { %p963_p2 = pneg %p1168_p0  ;;  %s974_s11 = scalar_lea.vmem %s167_s8, 1024 }
  0x16   : > { %p975_p3 = scmp.ne.s32.totalorder %s167_s8, %s974_s11  ;;  %s1071_s18 = smov [#allocation2]  }
  0x17   : > { %s979_s19 = sshll.u32 %s1071_s18, 4  ;;  %s980_s19 = int_to_ptr.vmem [resolvable:$false] %s979_s19 }
  0x18   : > { %p977_p5 = pnand %p975_p3, %p963_p2  ;;  %s981_s21 = scalar_lea.vmem %s980_s19, 2048 }
  0x19   : > { %p982_p7 = scmp.lt.s32.totalorder %s167_s8, %s980_s19  ;;  %p983_p10 = scmp.lt.s32.totalorder %s981_s21, %s974_s11 }
  0x1a   : > { %p978_p6 = pneg %p977_p5 }
  0x1b   : > { %p984_p12 = por %p983_p10, %p982_p7 }
  0x1d   : > { %p985_p4 = pnand %p984_p12, %p978_p6 }
  0x1f   : > { %988 = shalt.err (!%p985_p4)
}
  0x20   : > { %s1072_s22 = smov 256   ;;  %s1073_s23 = smov 16  }
  0x21   : > { %901 = dma.hbm_to_vmem [thread:$0]  (!%p1168_p0), %s165_s6, 1024, %s167_s8, %s154_s10, %s1072_s22, %s1072_s22, %s1073_s23  }
  0x22   : > { %p174_p13 = scmp.lt.s32.totalorder %s1069_s17, 3 }
  0x24   : > { %p175_p2 = pnand %p884_p1, %p174_p13 }
  0x25   : > { %s1181_s28 = sand.u32 (!%p175_p2), 1, %s1053_s13  }
  0x26   : > { %178 = sbr.rel (%p175_p2) target bundleno = 295 (0x127), region = 32  ;;  %s885_s29 = sshll.u32 (!%p175_p2), %s1181_s28, 6 }
  0x27   : > { %s181_s30 = scalar_lea.sflag (!%p175_p2), [#allocation3], %s1181_s28  ;;  %s184_s4 = scalar_lea.vmem (!%p175_p2), [#allocation2], %s885_s29 }
  0x2b   : > { %1040 = dma.done.wait (%p1144_p8), %s181_s30, 1024  }
  0x2c   : > { %1042 = vsyncadd (%p1144_p8), %s181_s30, 4294966272  ;;  %v1074_v0 = vmov 0.0   ;;  %v1075_v1 = vmov 0   ;;  %v218_v2 = vld [vmem:[%s184_s4 + $0x38] sm:$0xff]  ;;  %v217_v3 = vld [vmem:[%s184_s4 + $0x30] sm:$0xff]  ;;  %vm224_vm0 = vcmask 261120  }
  0x2d   : > { %300 = vmatprep.mubr.f32.mxu0 %v1074_v0  ;;  %416 = vmatprep.mubr.f32.mxu1 %v1074_v0  ;;  %v216_v4 = vld [vmem:[%s184_s4 + $0x28] sm:$0xff]  ;;  %v1191_v5 = vand.u32 4294901760, %v218_v2  ;;  %v1193_v6 = vand.u32 4294901760, %v217_v3  ;;  %v215_v8 = vld [vmem:[%s184_s4 + $0x20] sm:$0xff]  ;;  %v214_v9 = vld [vmem:[%s184_s4 + $0x18] sm:$0xff]  ;;  %s886_s8 = sshll.u32 %s1181_s28, 3 }
  0x2e   : > { %960 = vset.pattern.permute.xlu0 %v1075_v1  ;;  %v1195_v7 = vand.u32 4294901760, %v216_v4  ;;  %v213_v10 = vld [vmem:[%s184_s4 + $0x10] sm:$0xff]  ;;  %v1197_v11 = vand.u32 4294901760, %v215_v8  ;;  %v1199_v12 = vand.u32 4294901760, %v214_v9  ;;  %v212_v14 = vld [vmem:[%s184_s4 + $0x8] sm:$0xff]  ;;  %v211_v15 = vld [vmem:[%s184_s4] sm:$0xff] }
  0x2f   : > { %v1201_v13 = vand.u32 4294901760, %v213_v10  ;;  %253 = vmatprep.subr.mxu0 %v1191_v5  ;;  %v1204_v16 = vand.u32 4294901760, %v212_v14  ;;  %v1207_v17 = vsub.f32 %v218_v2, %v1191_v5  ;;  %v1209_v18 = vand.u32 4294901760, %v211_v15  ;;  %v209_v20 = vld [vmem:[%s1333_s1] sm:$0xf]  ;;  %s893_s9 = sshll.u32 %s1061_s15, 7 }
  0x30   : > { %v1212_v19 = vsub.f32 %v217_v3, %v1193_v6  ;;  %v210_v21 = vld [vmem:[%s1334_s2] sm:$0xf]  ;;  %255 = vmatpush1.msra.mxu0 %v1193_v6  ;;  %v1222_v22 = vsub.f32 %v216_v4, %v1195_v7  ;;  %v226_v23 = vsel %vm224_vm0, %v209_v20, 0  ;;  %v1226_v24 = vsub.f32 %v215_v8, %v1197_v11  ;;  %s206_s10 = scalar_lea.vmem [#allocation5], %s886_s8  ;;  %s791_s21 = scalar_lea.hbm %s1335_s3, %s893_s9 }
  0x31   : > { %v1229_v25 = vsub.f32 %v214_v9, %v1199_v12  ;;  %221 = vperm.xlu0 %960, %v210_v21   ;;  %257 = vmatprep.subr.mxu0 %v1195_v7  ;;  %v338_v26 = vand.u32 4294901760, %v1207_v17  ;;  %v1234_v28 = vand.u32 4294901760, %v226_v23  ;;  %v1237_v29 = vsub.f32 %v213_v10, %v1201_v13  ;;  %s793_s11 = sshll.u32 %s206_s10, 4  ;;  %s777_s22 = scalar_lea.sflag [#allocation4], %s1181_s28  ;;  %s794_s11 = int_to_ptr.vmem [resolvable:$true] %s793_s11 }
  0x32   : > { %v344_v27 = vand.u32 4294901760, %v1212_v19  ;;  %259 = vmatpush1.msra.mxu0 %v1197_v11  ;;  %v350_v30 = vand.u32 4294901760, %v1222_v22  ;;  %v356_v31 = vand.u32 4294901760, %v1226_v24  ;;  %v1244_v33 = vsub.f32 %v212_v14, %v1204_v16  ;;  %s989_s23 = scalar_lea.vmem %s794_s11, 128  ;;  %s1076_s29 = smov [#allocation5]  }
  0x33   : > { %v362_v32 = vand.u32 4294901760, %v1229_v25  ;;  %261 = vmatprep.subr.mxu0 %v1199_v12  ;;  %v339_v34 = vsub.f32 %v1207_v17, %v338_v26  ;;  %v302_v36 = vsub.f32 %v226_v23, %v1234_v28  ;;  %v368_v37 = vand.u32 4294901760, %v1237_v29  ;;  %p990_p8 = scmp.ne.s32.totalorder %s794_s11, %s989_s23  ;;  %s993_s30 = sshll.u32 %s1076_s29, 4  ;;  %s994_s30 = int_to_ptr.vmem [resolvable:$false] %s993_s30 }
  0x34   : > { %v345_v35 = vsub.f32 %v1212_v19, %v344_v27  ;;  %263 = vmatpush1.msra.mxu0 %v1201_v13  ;;  %v351_v38 = vsub.f32 %v1222_v22, %v350_v30  ;;  %v357_v39 = vsub.f32 %v1226_v24, %v356_v31  ;;  %v374_v41 = vand.u32 4294901760, %v1244_v33  ;;  %s995_s15 = scalar_lea.vmem %s994_s30, 256  ;;  %p996_p1 = scmp.lt.s32.totalorder %s794_s11, %s994_s30 }
  0x35   : > { %v363_v40 = vsub.f32 %v1229_v25, %v362_v32  ;;  %265 = vmatprep.subr.mxu0 %v1204_v16  ;;  %v340_v42 = vand.u32 4294901760, %v339_v34  ;;  %v303_v44 = vand.u32 4294901760, %v302_v36  ;;  %v369_v45 = vsub.f32 %v1237_v29, %v368_v37  ;;  %p991_p12 = pnand %p990_p8, %p1148_p9  ;;  %p997_p3 = scmp.lt.s32.totalorder %s995_s15, %s989_s23 }
  0x36   : > { %v346_v43 = vand.u32 4294901760, %v345_v35  ;;  %267 = vmatpush1.msra.mxu0 %v1209_v18  ;;  %v352_v46 = vand.u32 4294901760, %v351_v38  ;;  %v358_v47 = vand.u32 4294901760, %v357_v39  ;;  %v375_v48 = vsub.f32 %v1244_v33, %v374_v41 }
  0x37   : > { %341 = vmatprep.subr.mxu1 %v340_v42  ;;  %450 = vmatprep.subr.mxu0 %v1207_v17  ;;  %v304_v49 = vsub.f32 %v302_v36, %v303_v44  ;;  %v364_v50 = vand.u32 4294901760, %v363_v40  ;;  %v379_v51 = vsub.f32 %v211_v15, %v1209_v18  ;;  %v370_v52 = vand.u32 4294901760, %v369_v45  ;;  %p992_p0 = pneg %p991_p12  ;;  %p998_p5 = por %p997_p3, %p996_p1 }
  0x38   : > { %347 = vmatpush1.msra.mxu1 %v346_v43  ;;  %v376_v54 = vand.u32 4294901760, %v375_v48 }
  0x39   : > { %353 = vmatprep.subr.mxu1 %v352_v46  ;;  %v305_v53 = vand.u32 4294901760, %v304_v49  ;;  %v380_v55 = vand.u32 4294901760, %v379_v51  ;;  %p999_p6 = pnand %p998_p5, %p992_p0 }
  0x3a   : > { %359 = vmatpush1.msra.mxu1 %v358_v47 }
  0x3b   : > { %306 = vmatmul.mubr.f32.vlgmr.msra.gmra.mxu0 %v305_v53  ;;  %365 = vmatprep.subr.mxu1 %v364_v50  ;;  %v381_v56 = vsub.f32 %v379_v51, %v380_v55 }
  0x3c   : > { %453 = vmatpush1.msra.mxu0 %v1212_v19  ;;  %371 = vmatpush1.msra.mxu1 %v370_v52 }
  0x3d   : > { %456 = vmatprep.subr.mxu0 %v1222_v22  ;;  %377 = vmatprep.subr.mxu1 %v376_v54  ;;  %v382_v57 = vand.u32 4294901760, %v381_v56 }
  0x3e   : > { %459 = vmatpush1.msra.mxu0 %v1226_v24  ;;  %504 = vmatprep.mubr.f32.mxu0 %v1074_v0 }
  0x3f   : > { %462 = vmatprep.subr.mxu0 %v1229_v25  ;;  %383 = vmatpush1.msra.mxu1 %v382_v57 }
  0x40   : > { %465 = vmatpush1.msra.mxu0 %v1237_v29  ;;  %418 = vmatmul.mubr.f32.vlgmr.msra.gmra.mxu1 %v1234_v28 }
  0x41   : > { %468 = vmatprep.subr.mxu0 %v1244_v33  ;;  %538 = vmatprep.subr.mxu1 %v1191_v5 }
  0x42   : > { %471 = vmatpush1.msra.mxu0 %v379_v51  ;;  %540 = vmatpush1.msra.mxu1 %v1193_v6 }
  0x43   : > { %507 = vmatmul.mubr.f32.vlgmr.msra.gmra.mxu0 %v302_v36  ;;  %542 = vmatprep.subr.mxu1 %v1195_v7 }
  0x44   : > { %622 = vmatprep.subr.mxu0 %v338_v26  ;;  %544 = vmatpush1.msra.mxu1 %v1197_v11 }
  0x45   : > { %626 = vmatpush1.msra.mxu0 %v344_v27  ;;  %546 = vmatprep.subr.mxu1 %v1199_v12 }
  0x46   : > { %630 = vmatprep.subr.mxu0 %v350_v30  ;;  %548 = vmatpush1.msra.mxu1 %v1201_v13 }
  0x47   : > { %634 = vmatpush1.msra.mxu0 %v356_v31  ;;  %550 = vmatprep.subr.mxu1 %v1204_v16 }
  0x48   : > { %638 = vmatprep.subr.mxu0 %v362_v32  ;;  %552 = vmatpush1.msra.mxu1 %v1209_v18 }
  0x49   : > { %585 = vmatprep.mubr.f32.mxu1 %v1074_v0  ;;  %642 = vmatpush1.msra.mxu0 %v368_v37 }
  0x4a   : > { %589 = vmatmul.mubr.f32.vlgmr.msra.gmra.mxu1 %v303_v44  ;;  %646 = vmatprep.subr.mxu0 %v374_v41 }
  0x4b   : > { %716 = vmatprep.subr.mxu1 %v1191_v5  ;;  %650 = vmatpush1.msra.mxu0 %v380_v55 }
  0x4c   : > { %683 = vmatprep.mubr.f32.mxu0 %v1074_v0  ;;  %718 = vmatpush1.msra.mxu1 %v1193_v6 }
  0x4d   : > { %685 = vmatmul.mubr.f32.vlgmr.msra.gmra.mxu0 %v1234_v28  ;;  %720 = vmatprep.subr.mxu1 %v1195_v7 }
  0x4e   : > { %722 = vmatpush1.msra.mxu1 %v1197_v11  ;;  %763 = vmatprep.mubr.f32.mxu1 %v1074_v0 }
  0x4f   : > { %724 = vmatprep.subr.mxu1 %v1199_v12 }
  0x50   : > { %726 = vmatpush1.msra.mxu1 %v1201_v13 }
  0x51   : > { %728 = vmatprep.subr.mxu1 %v1204_v16 }
  0x52   : > { %730 = vmatpush1.msra.mxu1 %v1209_v18 }
  0x53   : > { %765 = vmatmul.mubr.f32.vlgmr.msra.gmra.mxu1 %v1234_v28 }
  0xac   : > { %v222_v59 = vpop.permute.xlu0 %221 }
  0xfb   : > { %v307_v58 = vpop.f32.mrf.mxu0 }
  0xfc   : > { %v308_v62 = vadd.f32 %v307_v58, %v222_v59 }
  0xfd   : > { %v309_v60 = vpop.f32.mrf.mxu0 }
  0xfe   : > { %v310_v63 = vadd.f32 %v309_v60, %v222_v59 }
 0x100   : > { %v419_v61 = vpop.f32.mrf.mxu1 }
 0x101   : > { %v420_v0 = vadd.f32 %v419_v61, %v308_v62 }
 0x102   : > { %v421_v1 = vpop.f32.mrf.mxu1 }
 0x103   : > { %v508_v2 = vpop.f32.mrf.mxu0  ;;  %v422_v3 = vadd.f32 %v421_v1, %v310_v63 }
 0x104   : > { %v509_v8 = vadd.f32 %v508_v2, %v420_v0 }
 0x105   : > { %v510_v5 = vpop.f32.mrf.mxu0 }
 0x106   : > { %v511_v9 = vadd.f32 %v510_v5, %v422_v3 }
 0x10a   : > { %v590_v4 = vpop.f32.mrf.mxu1 }
 0x10b   : > { %v591_v10 = vadd.f32 %v590_v4, %v509_v8 }
 0x10c   : > { %v592_v6 = vpop.f32.mrf.mxu1 }
 0x10d   : > { %v686_v7 = vpop.f32.mrf.mxu0  ;;  %v593_v11 = vadd.f32 %v592_v6, %v511_v9 }
 0x10e   : > { %v687_v14 = vadd.f32 %v686_v7, %v591_v10 }
 0x10f   : > { %v688_v12 = vpop.f32.mrf.mxu0 }
 0x110   : > { %v689_v15 = vadd.f32 %v688_v12, %v593_v11 }
 0x113   : > { %v766_v13 = vpop.f32.mrf.mxu1 }
 0x114   : > { %v767_v17 = vadd.f32 %v766_v13, %v687_v14 }
 0x115   : > { %v768_v16 = vpop.f32.mrf.mxu1 }
 0x116   : > { %v769_v18 = vadd.f32 %v768_v16, %v689_v15 }
 0x118   : > { %v773_v19 = vcombine.low %v767_v17, %v769_v18 }
 0x11a   : > { %775 = vst [vmem:[%s206_s10] sm:$0xff] %v773_v19 }
 0x11b   : > { %1002 = shalt.err (!%p999_p6)
}
 0x11c   : > { %s1003_s4 = scalar_lea.hbm %s791_s21, 128  ;;  %s1007_s5 = scalar_lea.hbm %s1335_s3, 256 }
 0x11d   : > { %p1004_p7 = scmp.ne.s32.totalorder %s791_s21, %s1003_s4  ;;  %p1008_p13 = scmp.lt.s32.totalorder %s791_s21, %s1335_s3 }
 0x11e   : > { %p1009_p2 = scmp.lt.s32.totalorder %s1007_s5, %s1003_s4 }
 0x11f   : > { %p1005_p10 = pnand %p1004_p7, %p1148_p9 }
 0x120   : > { %p1010_p8 = por %p1009_p2, %p1008_p13 }
 0x121   : > { %p1006_p4 = pneg %p1005_p10 }
 0x123   : > { %p1011_p12 = pnand %p1010_p8, %p1006_p4 }
 0x125   : > { %1014 = shalt.err (!%p1011_p12)
}
 0x126   : > { %896 = dma.vmem_to_hbm [thread:$0]  (%p1148_p9), %s794_s11, 128, %s791_s21, %s777_s22  }
 0x127 PF: > { %s805_s8 = sand.u32 1, %s1049_s12   ;;  %p1341_p0 = scmp.ge.s32.totalorder %s1069_s17, 2 }
 0x128   : > { %s806_s9 = scalar_lea.sflag [#allocation4], %s805_s8 }
 0x129   : > { %p903_p1 = pnand %p1341_p0, %p1155_p11 }
 0x12b   : > { %p904_p3 = pneg %p903_p1 }
 0x12d   : > { %1044 = dma.done.wait (%p904_p3), %s806_s9, 128  }
 0x12e   : > { %1046 = vsyncadd (%p904_p3), %s806_s9, 4294967168  ;;  %s19_s17 = sadd.s32 1, %s1069_s17   ;;  %s1342_s12 = smov %s1053_s13 }
 0x12f   : > { %p16_p5 = scmp.ge.s32.totalorder %s19_s17, 4   ;;  %s1343_s13 = smov %s1057_s14 }
 0x130   : > { %s1344_s14 = smov %s1153_s26  ;;  %s1345_s15 = smov %s1065_s16 }
 0x131   : > { %s1346_s16 = smov %s1348_s20  ;;  %18 = sbr.rel (!%p16_p5) target bundleno = 6 (0x6), region = 77 }
 0x136   :  { %811 = vsyncpa [#allocation3], 1 }
 0x137   :  { %813 = vsyncpa [#allocation3 + $0x1], 1 }
 0x138   :  { %814 = vsyncpa [#allocation4], 1 }
 0x139   :  { %816 = vsyncpa [#allocation4 + $0x1], 1 }

</bundles_post_ra>
